<compile_context>
chip_gen: v7x
topology: tpu7x:2x2x1
jax: 0.10.0
libtpu: 0.0.40
codegen_flags: <defaults>
</compile_context>

<pallas_src>
import functools

import jax
import jax.numpy as jnp
from jax.experimental import pallas as pl
from jax.experimental.pallas import tpu as pltpu


# Fits v7x (64 MiB physical / 32 MiB scoped default) and raises v5e's 16 MiB default.
_VMEM_LIMIT_BYTES = 32 * 1024 * 1024
_BLOCK_BUDGET_BYTES = 2 << 20   # ~2 MiB per x/out block (~85% of HBM roofline measured)


def _noise_act(x_ref, noise_ref, nw_ref, neg_slope):
    """NoiseLayer add + LeakyReLU on the current block, in f32."""
    x = x_ref[...].astype(jnp.float32)
    x = x + nw_ref[...].astype(jnp.float32) * noise_ref[...].astype(jnp.float32)
    # LeakyReLU(a) with 0 < a < 1:  max(x, a*x)  -> 1 mul + 1 max on the VPU.
    return jnp.maximum(x, jnp.float32(neg_slope) * x)


def _fused_kernel(x_ref, noise_ref, nw_ref, ss_ref, sb_ref, o_ref, *,
                  inv_hw, neg_slope, eps):
    """Whole (TC, HW) slab resident: one read, stats, one fused write."""
    x = _noise_act(x_ref, noise_ref, nw_ref, neg_slope)
    s1 = jnp.sum(x, axis=1, keepdims=True)
    s2 = jnp.sum(x * x, axis=1, keepdims=True)
    mean = s1 * jnp.float32(inv_hw)
    var = jnp.maximum(s2 * jnp.float32(inv_hw) - mean * mean, 0.0)
    inv_std = jax.lax.rsqrt(var + jnp.float32(eps))
    scale = ss_ref[...].astype(jnp.float32) * inv_std           # (TC, 1)
    shift = sb_ref[...].astype(jnp.float32) - mean * scale      # (TC, 1)
    o_ref[...] = (x * scale + shift).astype(o_ref.dtype)


def _tiled_kernel(x_ref, noise_ref, nw_ref, ss_ref, sb_ref, o_ref,
                  sum_ref, sq_ref, *, inv_hw, neg_slope, eps):
    """HW-tiled two-sweep kernel: pass 0 accumulates stats, pass 1 writes output."""
    p = pl.program_id(2)   # 0 = stats sweep, 1 = write sweep
    h = pl.program_id(3)   # HW tile index

    x = _noise_act(x_ref, noise_ref, nw_ref, neg_slope)

    @pl.when(p == 0)
    def _stats():
        @pl.when(h == 0)
        def _init():
            sum_ref[...] = jnp.zeros_like(sum_ref)
            sq_ref[...] = jnp.zeros_like(sq_ref)
        sum_ref[...] += jnp.sum(x, axis=1, keepdims=True)
        sq_ref[...] += jnp.sum(x * x, axis=1, keepdims=True)

    @pl.when(p == 1)
    def _write():
        mean = sum_ref[...] * jnp.float32(inv_hw)
        var = jnp.maximum(sq_ref[...] * jnp.float32(inv_hw) - mean * mean, 0.0)
        inv_std = jax.lax.rsqrt(var + jnp.float32(eps))
        scale = ss_ref[...].astype(jnp.float32) * inv_std
        shift = sb_ref[...].astype(jnp.float32) - mean * scale
        o_ref[...] = (x * scale + shift).astype(o_ref.dtype)


def _sublane_multiple(dtype):
    bits = jnp.dtype(dtype).itemsize * 8
    return max(8, 256 // bits)        # 8 for f32, 16 for bf16, 32 for int8/fp8


def _pick_tiles(C, HW, itemsize, sub, budget_bytes):
    """Pick (channel_tile, hw_tile) so one block fits the per-block VMEM budget."""
    if C * HW * itemsize <= budget_bytes:
        return C, HW
    # Shrink channels first (keeps instance-norm stats a single block per (n, c-tile)).
    c_cands = [c for c in range(sub * (C // sub), 0, -sub) if C % c == 0]
    for tc in c_cands:
        if tc * HW * itemsize <= budget_bytes:
            return tc, HW
    # Still too big (high-res layers): tile the spatial axis too.
    tc = c_cands[-1] if c_cands else C
    hw_cands = [h for h in range(128 * (HW // 128), 0, -128) if HW % h == 0]
    for thw in hw_cands:
        if tc * thw * itemsize <= budget_bytes:
            return tc, thw
    return tc, (hw_cands[-1] if hw_cands else HW)


def layer_epilogue_pallas(x, noise, noise_weight, dlatent, lin_weight, lin_bias, *,
                          w_mul, b_mul, negative_slope=0.2, eps=1e-5,
                          block_budget_bytes=_BLOCK_BUDGET_BYTES):
    """Pallas equivalent of LayerEpilogue.forward(x, dlatent) with explicit noise."""
    assert x.ndim == 4
    N, C, H, W = x.shape
    D = dlatent.shape[-1]
    HW = H * W
    assert noise.shape == (N, 1, H, W)
    assert noise_weight.shape == (C,)
    assert dlatent.shape == (N, D)
    assert lin_weight.shape == (2 * C, D)
    assert lin_bias.shape == (2 * C,)

    # --- StyleMod linear hoisted to the wrapper: one tiny XLA matmul, computed once ---
    style = (dlatent.astype(jnp.float32)
             @ (lin_weight.astype(jnp.float32) * jnp.float32(w_mul)).T
             + lin_bias.astype(jnp.float32) * jnp.float32(b_mul))            # (N, 2C)
    style_scale = (style[:, :C] + 1.0).reshape(N, C, 1)                      # x * (s0+1)
    style_shift = style[:, C:].reshape(N, C, 1)                              # + s1

    # --- Layout plumbing: lane-dense flattened spatial dim, 2-D params ---
    x2 = x.reshape(N, C, HW)
    noise2 = noise.reshape(N, 1, HW)
    nw = noise_weight.reshape(C, 1)

    itemsize = x.dtype.itemsize
    sub = _sublane_multiple(x.dtype)
    TC, THW = _pick_tiles(C, HW, itemsize, sub, block_budget_bytes)
    num_cblk = C // TC
    num_hw = HW // THW
    inv_hw = 1.0 / float(HW)

    x_bytes = N * C * HW * itemsize
    cost = pl.CostEstimate(
        flops=12 * N * C * HW,
        transcendentals=N * C * num_hw,
        bytes_accessed=int(x_bytes * (2 if num_hw == 1 else 3)
                           + N * HW * itemsize * (1 if num_hw == 1 else 2)
                           + 4 * (3 * N * C + C)),
    )

    if num_hw == 1:
        # Whole (TC, HW) slab per step: single fused sweep, x read exactly once.
        kernel = functools.partial(_fused_kernel, inv_hw=inv_hw,
                                   neg_slope=float(negative_slope), eps=float(eps))
        grid_spec = pltpu.PrefetchScalarGridSpec(
            num_scalar_prefetch=0,
            grid=(N, num_cblk),
            in_specs=[
                pl.BlockSpec((pl.Squeezed(), TC, HW), lambda n, j: (n, j, 0)),   # x
                pl.BlockSpec((pl.Squeezed(), 1, HW), lambda n, j: (n, 0, 0)),    # noise
                pl.BlockSpec((TC, 1), lambda n, j: (j, 0)),                      # noise w
                pl.BlockSpec((pl.Squeezed(), TC, 1), lambda n, j: (n, j, 0)),    # style scale
                pl.BlockSpec((pl.Squeezed(), TC, 1), lambda n, j: (n, j, 0)),    # style shift
            ],
            out_specs=pl.BlockSpec((pl.Squeezed(), TC, HW), lambda n, j: (n, j, 0)),
        )
        compiler_params = pltpu.CompilerParams(
            dimension_semantics=("parallel", "parallel"),
            vmem_limit_bytes=_VMEM_LIMIT_BYTES)
    else:
        # High-resolution layers: tile HW, accumulate stats (sweep 0), write (sweep 1).
        kernel = functools.partial(_tiled_kernel, inv_hw=inv_hw,
                                   neg_slope=float(negative_slope), eps=float(eps))
        grid_spec = pltpu.PrefetchScalarGridSpec(
            num_scalar_prefetch=0,
            grid=(N, num_cblk, 2, num_hw),
            in_specs=[
                pl.BlockSpec((pl.Squeezed(), TC, THW), lambda n, j, p, h: (n, j, h)),
                pl.BlockSpec((pl.Squeezed(), 1, THW), lambda n, j, p, h: (n, 0, h)),
                pl.BlockSpec((TC, 1), lambda n, j, p, h: (j, 0)),
                pl.BlockSpec((pl.Squeezed(), TC, 1), lambda n, j, p, h: (n, j, 0)),
                pl.BlockSpec((pl.Squeezed(), TC, 1), lambda n, j, p, h: (n, j, 0)),
            ],
            # Pass 0 parks the output index at the first HW block (never written there),
            # pass 1 writes every HW block exactly once -> no redundant writeback.
            out_specs=pl.BlockSpec((pl.Squeezed(), TC, THW),
                                   lambda n, j, p, h: (n, j, h * p)),
            scratch_shapes=[pltpu.VMEM((TC, 1), jnp.float32),   # sum
                            pltpu.VMEM((TC, 1), jnp.float32)],  # sum of squares
        )
        compiler_params = pltpu.CompilerParams(
            dimension_semantics=("parallel", "parallel", "arbitrary", "arbitrary"),
            vmem_limit_bytes=_VMEM_LIMIT_BYTES)

    out = pl.pallas_call(
        kernel,
        out_shape=jax.ShapeDtypeStruct((N, C, HW), x.dtype),
        grid_spec=grid_spec,
        compiler_params=compiler_params,
        cost_estimate=cost,
    )(x2, noise2, nw, style_scale, style_shift)

    return out.reshape(N, C, H, W)


def layer_epilogue_reference(x, noise, noise_weight, dlatent, lin_weight, lin_bias,
                             *, w_mul, b_mul, negative_slope=0.2, eps=1e-5):
    """Pure-JAX reference mirroring the PyTorch module semantics."""
    N, C, H, W = x.shape
    x = x + noise_weight.reshape(1, C, 1, 1) * noise
    x = jnp.where(x >= 0, x, negative_slope * x)
    mean = jnp.mean(x, axis=(2, 3), keepdims=True)
    var = jnp.mean((x - mean) ** 2, axis=(2, 3), keepdims=True)
    x = (x - mean) / jnp.sqrt(var + eps)
    style = dlatent @ (lin_weight * w_mul).T + lin_bias * b_mul
    style = style.reshape(N, 2, C, 1, 1)
    return x * (style[:, 0] + 1.0) + style[:, 1]


if __name__ == "__main__":
    N, C, H, W, D = 2, 4, 16, 16, 32
    key = jax.random.PRNGKey(0)
    kx, kn, kw, kl, klw, klb = jax.random.split(key, 6)

    x = jax.random.normal(kx, (N, C, H, W), dtype=jnp.float32)
    noise = jax.random.normal(kn, (N, 1, H, W), dtype=jnp.float32)
    noise_weight = 0.1 * jax.random.normal(kw, (C,), dtype=jnp.float32)
    dlatent = jax.random.normal(kl, (N, D), dtype=jnp.float32)
    lin_weight = jax.random.normal(klw, (2 * C, D), dtype=jnp.float32)   # init_std=1 (use_wscale)
    lin_bias = 0.1 * jax.random.normal(klb, (2 * C,), dtype=jnp.float32)

    w_mul = 1.0 * (D ** -0.5)   # MyLinear: gain=1.0, use_wscale=True, lrmul=1
    b_mul = 1.0

    ref = layer_epilogue_reference(x, noise, noise_weight, dlatent, lin_weight, lin_bias,
                                   w_mul=w_mul, b_mul=b_mul)

    # Fast path: whole (TC, HW) slab fits the budget -> single fused sweep.
    out = layer_epilogue_pallas(x, noise, noise_weight, dlatent, lin_weight, lin_bias,
                                w_mul=w_mul, b_mul=b_mul)
    out = jax.block_until_ready(out)
    assert out.shape == x.shape, out.shape
    assert out.dtype == x.dtype, out.dtype
    assert jnp.allclose(out, ref, atol=1e-5, rtol=1e-5), \
        float(jnp.max(jnp.abs(out - ref)))

    # Force the HW-tiled two-sweep path (exercises high-resolution handling).
    out_tiled = layer_epilogue_pallas(x, noise, noise_weight, dlatent, lin_weight,
                                      lin_bias, w_mul=w_mul, b_mul=b_mul,
                                      block_budget_bytes=1024)
    out_tiled = jax.block_until_ready(out_tiled)
    assert jnp.allclose(out_tiled, ref, atol=1e-5, rtol=1e-5), \
        float(jnp.max(jnp.abs(out_tiled - ref)))

    print("KERNEL_OK")
</pallas_src>

<mosaic_0001>
module attributes {stable_mosaic.version = 11 : i64} {
  func.func @_fused_kernel(%arg0: i32, %arg1: i32, %arg2: memref<1x4x256xf32, #tpu.memory_space<vmem>>, %arg3: memref<1x1x256xf32, #tpu.memory_space<vmem>>, %arg4: memref<4x1xf32, #tpu.memory_space<vmem>>, %arg5: memref<1x4x1xf32, #tpu.memory_space<vmem>>, %arg6: memref<1x4x1xf32, #tpu.memory_space<vmem>>, %arg7: memref<1x4x256xf32, #tpu.memory_space<vmem>>) attributes {dimension_semantics = [#tpu.dimension_semantics<parallel>, #tpu.dimension_semantics<parallel>], iteration_bounds = array<i64: 2, 1>, scalar_prefetch = 0 : i64, scratch_operands = 0 : i64, tpu.core_type = #tpu.core_type<tc>, window_params = [{transform_indices = @transform_0, window_bounds = array<i64: 1, 4, 256>}, {transform_indices = @transform_1, window_bounds = array<i64: 1, 1, 256>}, {transform_indices = @transform_2, window_bounds = array<i64: 4, 1>}, {transform_indices = @transform_3, window_bounds = array<i64: 1, 4, 1>}, {transform_indices = @transform_4, window_bounds = array<i64: 1, 4, 1>}, {transform_indices = @transform_5, window_bounds = array<i64: 1, 4, 256>}]} {
    %c0 = arith.constant 0 : index
    %c0_0 = arith.constant 0 : index
    %c0_1 = arith.constant 0 : index
    %0 = vector.load %arg2[%c0, %c0_0, %c0_1] : memref<1x4x256xf32, #tpu.memory_space<vmem>>, vector<1x4x256xf32>
    %1 = vector.shape_cast %0 : vector<1x4x256xf32> to vector<4x256xf32>
    %c0_2 = arith.constant 0 : index
    %c0_3 = arith.constant 0 : index
    %2 = vector.load %arg4[%c0_2, %c0_3] : memref<4x1xf32, #tpu.memory_space<vmem>>, vector<4x1xf32>
    %c0_4 = arith.constant 0 : index
    %c0_5 = arith.constant 0 : index
    %c0_6 = arith.constant 0 : index
    %3 = vector.load %arg3[%c0_4, %c0_5, %c0_6] : memref<1x1x256xf32, #tpu.memory_space<vmem>>, vector<1x1x256xf32>
    %4 = vector.shape_cast %3 : vector<1x1x256xf32> to vector<1x256xf32>
    %5 = vector.broadcast %2 : vector<4x1xf32> to vector<4x256xf32>
    %6 = vector.broadcast %4 : vector<1x256xf32> to vector<4x256xf32>
    %7 = arith.mulf %5, %6 : vector<4x256xf32>
    %8 = arith.addf %1, %7 : vector<4x256xf32>
    %cst = arith.constant 2.000000e-01 : f32
    %9 = vector.broadcast %cst : f32 to vector<4x256xf32>
    %10 = arith.mulf %9, %8 : vector<4x256xf32>
    %11 = arith.maximumf %8, %10 : vector<4x256xf32>
    %cst_7 = arith.constant dense<0.000000e+00> : vector<4xf32>
    %12 = vector.multi_reduction <add>, %11, %cst_7 [1] : vector<4x256xf32> to vector<4xf32>
    %13 = vector.shape_cast %12 : vector<4xf32> to vector<4x1xf32>
    %14 = arith.mulf %11, %11 : vector<4x256xf32>
    %cst_8 = arith.constant dense<0.000000e+00> : vector<4xf32>
    %15 = vector.multi_reduction <add>, %14, %cst_8 [1] : vector<4x256xf32> to vector<4xf32>
    %16 = vector.shape_cast %15 : vector<4xf32> to vector<4x1xf32>
    %cst_9 = arith.constant 3.906250e-03 : f32
    %17 = vector.broadcast %cst_9 : f32 to vector<4x1xf32>
    %18 = arith.mulf %13, %17 : vector<4x1xf32>
    %cst_10 = arith.constant 3.906250e-03 : f32
    %19 = vector.broadcast %cst_10 : f32 to vector<4x1xf32>
    %20 = arith.mulf %16, %19 : vector<4x1xf32>
    %21 = arith.mulf %18, %18 : vector<4x1xf32>
    %22 = arith.subf %20, %21 : vector<4x1xf32>
    %cst_11 = arith.constant 0.000000e+00 : f32
    %23 = vector.broadcast %cst_11 : f32 to vector<4x1xf32>
    %24 = arith.maximumf %22, %23 : vector<4x1xf32>
    %cst_12 = arith.constant 9.99999974E-6 : f32
    %25 = vector.broadcast %cst_12 : f32 to vector<4x1xf32>
    %26 = arith.addf %24, %25 : vector<4x1xf32>
    %27 = math.rsqrt %26 : vector<4x1xf32>
    %c0_13 = arith.constant 0 : index
    %c0_14 = arith.constant 0 : index
    %c0_15 = arith.constant 0 : index
    %28 = vector.load %arg5[%c0_13, %c0_14, %c0_15] : memref<1x4x1xf32, #tpu.memory_space<vmem>>, vector<1x4x1xf32>
    %29 = vector.shape_cast %28 : vector<1x4x1xf32> to vector<4x1xf32>
    %30 = arith.mulf %29, %27 : vector<4x1xf32>
    %c0_16 = arith.constant 0 : index
    %c0_17 = arith.constant 0 : index
    %c0_18 = arith.constant 0 : index
    %31 = vector.load %arg6[%c0_16, %c0_17, %c0_18] : memref<1x4x1xf32, #tpu.memory_space<vmem>>, vector<1x4x1xf32>
    %32 = vector.shape_cast %31 : vector<1x4x1xf32> to vector<4x1xf32>
    %33 = arith.mulf %18, %30 : vector<4x1xf32>
    %34 = arith.subf %32, %33 : vector<4x1xf32>
    %35 = vector.broadcast %30 : vector<4x1xf32> to vector<4x256xf32>
    %36 = arith.mulf %11, %35 : vector<4x256xf32>
    %37 = vector.broadcast %34 : vector<4x1xf32> to vector<4x256xf32>
    %38 = arith.addf %36, %37 : vector<4x256xf32>
    %c0_19 = arith.constant 0 : index
    %c0_20 = arith.constant 0 : index
    %c0_21 = arith.constant 0 : index
    %39 = vector.load %arg7[%c0_19, %c0_20, %c0_21] : memref<1x4x256xf32, #tpu.memory_space<vmem>>, vector<1x4x256xf32>
    %40 = vector.shape_cast %39 : vector<1x4x256xf32> to vector<4x256xf32>
    %41 = vector.shape_cast %38 : vector<4x256xf32> to vector<1x4x256xf32>
    tpu.vector_store %arg7[%c0_19, %c0_20, %c0_21], %41 {strides = array<i32>} : memref<1x4x256xf32, #tpu.memory_space<vmem>>, vector<1x4x256xf32>,
    return
  }
  func.func @transform_0(%arg0: i32, %arg1: i32) -> (i32, i32, i32) {
    %c0_i32 = arith.constant 0 : i32
    %c0_i32_0 = arith.constant 0 : i32
    return %arg0, %arg1, %c0_i32 : i32, i32, i32
  }
  func.func @transform_1(%arg0: i32, %arg1: i32) -> (i32, i32, i32) {
    %c0_i32 = arith.constant 0 : i32
    %c0_i32_0 = arith.constant 0 : i32
    %c0_i32_1 = arith.constant 0 : i32
    return %arg0, %c0_i32, %c0_i32_0 : i32, i32, i32
  }
  func.func @transform_2(%arg0: i32, %arg1: i32) -> (i32, i32) {
    %c0_i32 = arith.constant 0 : i32
    %c0_i32_0 = arith.constant 0 : i32
    return %arg1, %c0_i32 : i32, i32
  }
  func.func @transform_3(%arg0: i32, %arg1: i32) -> (i32, i32, i32) {
    %c0_i32 = arith.constant 0 : i32
    %c0_i32_0 = arith.constant 0 : i32
    return %arg0, %arg1, %c0_i32 : i32, i32, i32
  }
  func.func @transform_4(%arg0: i32, %arg1: i32) -> (i32, i32, i32) {
    %c0_i32 = arith.constant 0 : i32
    %c0_i32_0 = arith.constant 0 : i32
    return %arg0, %arg1, %c0_i32 : i32, i32, i32
  }
  func.func @transform_5(%arg0: i32, %arg1: i32) -> (i32, i32, i32) {
    %c0_i32 = arith.constant 0 : i32
    %c0_i32_0 = arith.constant 0 : i32
    return %arg0, %arg1, %c0_i32 : i32, i32, i32
  }
}

</mosaic_0001>

<bundles_post_ra>
// kernel: tpu_custom_call.1
= control target key start
LH: loop header
LB: loop body
LE: loop exit
PB: predicated region body
PF: predicated region fallthrough
CT: control target
= control target key end

     0   :  { %10 = vsyncpa [#allocation3], 0  ;;  %s901_s0 = inlined_call_operand.vmem [shape: f32[2,4,256], index: 0, kind: input, shape index: {}]   ;;  %s902_s1 = inlined_call_operand.vmem [shape: f32[2,1,256], index: 1, kind: input, shape index: {}]   ;;  %s903_s2 = inlined_call_operand.vmem [shape: f32[4,1], index: 2, kind: input, shape index: {}]   ;;  %s904_s3 = inlined_call_operand.vmem [shape: f32[2,4,1], index: 3, kind: input, shape index: {}]   ;;  %s905_s4 = inlined_call_operand.vmem [shape: f32[2,4,1], index: 4, kind: input, shape index: {}]   ;;  %s906_s5 = inlined_call_operand.hbm [shape: f32[2,4,256], index: 5, kind: output, shape index: {}]  }
   0x1   :  { %12 = vsyncpa [#allocation3 + $0x1], 0  ;;  %s772_s18 = smov 0   ;;  %s774_s19 = smov 0  }
   0x2   :  { %s776_s20 = smov 0   ;;  %s778_s21 = smov 0  }
   0x3   :  { %s780_s22 = smov 0   ;;  %s782_s23 = smov 0  }
   0x4 LB: > { %s579_s24 = sadd.s32 4294967295, %s737_s23   ;;  %s580_s25 = sadd.s32 4294967294, %s737_s23   ;;  %s737_s23 = sphi %s782_s23, %s18_s23   ;;  %s733_s22 = sphi %s780_s22, %s913_s22   ;;  %s729_s21 = sphi %s778_s21, %s912_s21   ;;  %s725_s20 = sphi %s776_s20, %s911_s20   ;;  %s721_s19 = sphi %s774_s19, %s910_s19   ;;  %s717_s18 = sphi %s772_s18, %s909_s18  }
   0x5   : > { %s30_s26 = sadd.s32 1, %s733_s22  ;;  %s175_s27 = sadd.s32 1, %s725_s20 }
   0x6   : > { %p32_p0 = scmp.ge.s32.totalorder %s30_s26, 2  ;;  %p185_p1 = scmp.ne.s32.totalorder %s725_s20, %s721_s19 }
   0x7   : > { %p186_p2 = scmp.eq.s32.totalorder %s579_s24, 1  ;;  %p191_p3 = scmp.ne.s32.totalorder %s721_s19, %s717_s18 }
   0x8   : > { %s915_s26 = smov (%p32_p0, %s30_s26), 0  ;;  %p192_p5 = scmp.eq.s32.totalorder %s580_s25, 1 }
   0x9   : > { %p812_p4 = por %p186_p2, %p185_p1  ;;  %s170_s29 = ssub.s32 %s733_s22, %s915_s26 }
   0xa   : > { %p584_p6 = scmp.ge.s32.totalorder %s737_s23, 1  ;;  %p173_p7 = scmp.eq.s32.totalorder %s170_s29, 0 }
   0xb   : > { %p819_p8 = por %p192_p5, %p191_p3  ;;  %p256_p9 = scmp.lt.s32.totalorder %s737_s23, 3 }
   0xc   : > { %s825_s6 = scalar_select %p173_p7, %s725_s20, %s175_s27  }
   0xd   : > { %p257_p10 = pnand %p584_p6, %p256_p9 }
   0xe   : > { %v342_v0 = vld [vmem:[%s903_s2] sm:$0xf] (!%p257_p10)  ;;  %v739_v1 = vmov (!%p257_p10), 0   ;;  %p310_p11 = scmp.lt.s32.totalorder (!%p257_p10), %s729_s21, 1  ;;  %v350_v2 = vlaneseq (!%p257_p10)  ;;  %vm372_vm0 = vcmask (!%p257_p10), 1043456   ;;  %s597_s12 = sshll.u32 (!%p257_p10), %s729_s21, 7 }
   0xf   : > { %260 = sbr.rel (%p257_p10) target bundleno = 474 (0x1da), region = 40  ;;  %655 = vset.pattern.permute.xlu0 (!%p257_p10), %v739_v1  ;;  %656 = vset.pattern.permute.xlu1 (!%p257_p10), %v739_v1  ;;  %v740_v40 = vmov (!%p257_p10), 839922192  }
  0x10   : > { %346 = vperm.xlu0 (!%p257_p10), %655, %v342_v0   ;;  %v351_v3 = vshrl.u32 (!%p257_p10), %v350_v2, 7  ;;  %v404_v41 = vunpack.c.l.s4 (!%p257_p10), %v740_v40 }
  0x12   : > { %v352_v4 = vsub.s32 (!%p257_p10), 0, %v351_v3  ;;  %v356_v5 = vsub.s32 (!%p257_p10), 1, %v351_v3  ;;  %v405_v42 = vunpack.c.0.s8 (!%p257_p10), %v404_v41 }
  0x14   : > { %v408_v43 = vsub.s32 (!%p257_p10), %v405_v42, %v351_v3 }
  0x16   : > { %s832_s9 = scalar_select %p310_p11, %s729_s21, 1 }
  0x17   : > { %s741_s21 = smov [#allocation2]  }
  0x18   : > { %s588_s10 = sshll.u32 %s832_s9, 1  ;;  %s596_s14 = sshll.u32 %s832_s9, 3 }
  0x19   : > { %s322_s13 = scalar_lea.vmem %s902_s1, %s588_s10  ;;  %s318_s17 = scalar_lea.vmem %s901_s0, %s596_s14 }
  0x1a   : > { %v343_v6 = vld [vmem:[%s322_s13] sm:$0x3]  ;;  %s589_s24 = sshll.u32 %s832_s9, 2  ;;  %s307_s9 = sand.u32 1, %s721_s19  }
  0x1b   : > { %v353_v7 = vrot.slane %v343_v6, %v352_v4  ;;  %v357_v8 = vrot.slane %v343_v6, %v356_v5  ;;  %v341_v12 = vld [vmem:[%s318_s17] sm:$0xff]  ;;  %s333_s29 = scalar_lea.vmem %s904_s3, %s589_s24  ;;  %s340_s10 = scalar_lea.vmem %s905_s4, %s589_s24 }
  0x1c   : > { %v394_v34 = vld [vmem:[%s333_s29] sm:$0xf]  ;;  %s585_s11 = sshll.u32 %s307_s9, 3  ;;  %s854_s17 = scalar_lea.hbm %s906_s5, %s597_s12 }
  0x1d   : > { %v396_v37 = vld [vmem:[%s340_s10] sm:$0xf]  ;;  %s309_s13 = scalar_lea.vmem [#allocation2], %s585_s11  ;;  %s427_s24 = scalar_lea.sflag [#allocation3], %s307_s9 }
  0x1e   : > { %s443_s14 = sshll.u32 %s309_s13, 4  ;;  %s663_s27 = sshll.u32 %s741_s21, 4  ;;  %s856_s14 = int_to_ptr.vmem [resolvable:$true] %s443_s14  ;;  %s664_s27 = int_to_ptr.vmem [resolvable:$false] %s663_s27 }
  0x1f   : > { %s659_s25 = scalar_lea.vmem %s856_s14, 128  ;;  %s665_s29 = scalar_lea.vmem %s664_s27, 256 }
  0x20   : > { %p660_p12 = scmp.ne.s32.totalorder %s856_s14, %s659_s25  ;;  %p666_p1 = scmp.lt.s32.totalorder %s856_s14, %s664_s27 }
  0x21   : > { %p667_p2 = scmp.lt.s32.totalorder %s665_s29, %s659_s25 }
  0x22   : > { %p661_p13 = pnand %p660_p12, %p812_p4 }
  0x23   : > { %p668_p3 = por %p667_p2, %p666_p1 }
  0x24   : > { %p662_p0 = pneg %p661_p13 }
  0x26   : > { %p669_p5 = pnand %p668_p3, %p662_p0 }
  0x8f   : > { %v347_v9 = vpop.permute.xlu0 %346 }
  0x90   : > { %v360_v10 = vmul.f32 %v353_v7, %v347_v9  ;;  %v361_v11 = vmul.f32 %v357_v8, %v347_v9 }
  0x92   : > { %v364_v13 = vcombine.low %v360_v10, %v361_v11 }
  0x94   : > { %v366_v14 = vadd.f32 %v364_v13, %v341_v12 }
  0x96   : > { %v367_v15 = vmul.f32 0.2, %v366_v14 }
  0x98   : > { %v368_v16 = vmax.f32 %v366_v14, %v367_v15 }
  0x9a   : > { %v370_v17 = vcombine.high %v368_v16, %v368_v16  ;;  %v378_v18 = vmul.f32 %v368_v16, %v368_v16  ;;  %v373_v19 = vsel %vm372_vm0, %v368_v16, 0.0 }
  0x9c   : > { %v374_v20 = vsel %vm372_vm0, %v370_v17, 0.0  ;;  %v380_v21 = vcombine.high %v378_v18, %v378_v18  ;;  %v382_v23 = vsel %vm372_vm0, %v378_v18, 0.0 }
  0x9d   : > { %v375_v22 = vadd.f32 %v374_v20, %v373_v19 }
  0x9e   : > { %v383_v24 = vsel %vm372_vm0, %v380_v21, 0.0 }
  0x9f   : > { %376 = vadd.xlane.f32.xlu0 %v375_v22  ;;  %v384_v25 = vadd.f32 %v383_v24, %v382_v23 }
  0xa1   : > { %385 = vadd.xlane.f32.xlu1 %v384_v25 }
 0x12c   : > { %v377_v26 = vpop.xlane.xlu0 %376 }
 0x12d   : > { %v387_v27 = vmul.f32 0.00390625, %v377_v26 }
 0x12e   : > { %v386_v28 = vpop.xlane.xlu1 %385 }
 0x12f   : > { %v389_v29 = vmul.f32 %v387_v27, %v387_v27  ;;  %v388_v30 = vmul.f32 0.00390625, %v386_v28 }
 0x131   : > { %v390_v31 = vsub.f32 %v388_v30, %v389_v29 }
 0x133   : > { %v391_v32 = vmax.f32 %v390_v31, 0.0 }
 0x135   : > { %v392_v33 = vadd.f32 1e-05, %v391_v32 }
 0x137   : > { %657 = vrsqrt.f32 %v392_v33 }
 0x141   : > { %v658_v35 = vpop.eup %657 }
 0x142   : > { %v395_v36 = vmul.f32 %v658_v35, %v394_v34 }
 0x144   : > { %401 = vperm.xlu1 %656, %v395_v36   ;;  %v397_v38 = vmul.f32 %v395_v36, %v387_v27 }
 0x146   : > { %v398_v39 = vsub.f32 %v396_v37, %v397_v38 }
 0x148   : > { %414 = vperm.xlu1 %656, %v398_v39  }
 0x1c3   : > { %v402_v44 = vpop.permute.xlu1 %401 }
 0x1c4   : > { %v409_v45 = vrot.slane %v402_v44, %v408_v43 }
 0x1c6   : > { %v411_v47 = vmul.f32 %v409_v45, %v368_v16 }
 0x1c7   : > { %v415_v46 = vpop.permute.xlu1 %414 }
 0x1c8   : > { %v422_v48 = vrot.slane %v415_v46, %v408_v43 }
 0x1ca   : > { %v424_v49 = vadd.f32 %v422_v48, %v411_v47 }
 0x1cc   : > { %425 = vst [vmem:[%s309_s13] sm:$0xff] %v424_v49 }
 0x1cd   : > { %672 = shalt.err (!%p669_p5)
}
 0x1ce   : > { %s673_s7 = scalar_lea.hbm %s854_s17, 128  ;;  %s677_s9 = scalar_lea.hbm %s906_s5, 256 }
 0x1cf   : > { %p674_p6 = scmp.ne.s32.totalorder %s854_s17, %s673_s7  ;;  %p678_p10 = scmp.lt.u32.totalorder %s854_s17, %s906_s5 }
 0x1d0   : > { %p679_p11 = scmp.lt.u32.totalorder %s677_s9, %s673_s7  ;;  %p681_p13 = scmp.lt.u32.totalorder %s673_s7, %s854_s17 }
 0x1d1   : > { %p675_p7 = pnand %p674_p6, %p812_p4 }
 0x1d2   : > { %p680_p12 = por %p679_p11, %p678_p10 }
 0x1d3   : > { %p676_p9 = pneg %p675_p7 }
 0x1d4   : > { %p682_p0 = por %p681_p13, %p680_p12 }
 0x1d6   : > { %p683_p1 = pnand %p682_p0, %p676_p9 }
 0x1d8   : > { %686 = shalt.err (!%p683_p1)
}
 0x1d9   : > { %598 = dma.vmem_to_hbm [thread:$0]  (%p812_p4), %s856_s14, 128, %s854_s17, %s427_s24  }
 0x1da PF: > { %p604_p2 = scmp.ge.s32.totalorder %s737_s23, 2  ;;  %s455_s13 = sand.u32 1, %s717_s18  }
 0x1db   : > { %s456_s15 = scalar_lea.sflag [#allocation3], %s455_s13 }
 0x1dc   : > { %p601_p3 = pnand %p604_p2, %p819_p8 }
 0x1de   : > { %712 = dma.done.wait (!%p601_p3), %s456_s15, 128  }
 0x1df   : > { %714 = vsyncadd (!%p601_p3), %s456_s15, 4294967168  ;;  %s18_s23 = sadd.s32 1, %s737_s23   ;;  %s909_s18 = smov %s721_s19 }
 0x1e0   : > { %p15_p5 = scmp.ge.s32.totalorder %s18_s23, 4   ;;  %s910_s19 = smov %s725_s20 }
 0x1e1   : > { %s911_s20 = smov %s825_s6  ;;  %s912_s21 = smov %s733_s22 }
 0x1e2   : > { %s913_s22 = smov %s915_s26  ;;  %17 = sbr.rel (!%p15_p5) target bundleno = 4 (0x4), region = 87 }
 0x1e9   :  { %461 = vsyncpa [#allocation3], 1 }
 0x1ea   :  { %463 = vsyncpa [#allocation3 + $0x1], 1 }

</bundles_post_ra>
